<compile_context>
chip_gen: v5e
topology: v5e:2x2
jax: 0.10.0
libtpu: 0.0.40
codegen_flags: <defaults>
</compile_context>

<pallas_src>
import functools

import jax
import jax.numpy as jnp
from jax.experimental import pallas as pl
from jax.experimental.pallas import tpu as pltpu


def _round_up(x, m):
    return ((x + m - 1) // m) * m


# ----------------------------------------------------------------------------
# Tiled 1x1-conv kernel: y[tile] = x[tile] @ W + b   (bias fused in epilogue)
# ----------------------------------------------------------------------------
def _conv1x1_bias_kernel(x_ref, w_ref, b_ref, o_ref):
    # x_ref: [tm, Cin], w_ref: [Cin, Cout], b_ref: [1, Cout], o_ref: [tm, Cout]
    y = jnp.dot(
        x_ref[...].astype(jnp.float32),
        w_ref[...].astype(jnp.float32),
        preferred_element_type=jnp.float32,
    )
    o_ref[...] = (y + b_ref[...].astype(jnp.float32)).astype(o_ref.dtype)


def conv1x1(x_flat, w_mat, b_row, *, tile_m=1024):
    """1x1 convolution as a Pallas matmul tiled over the M = N*H*W axis.

    x_flat: [M, Cin]   w_mat: [Cin, Cout]   b_row: [1, Cout]   -> [M, Cout]
    """
    M, Cin = x_flat.shape
    Cout = w_mat.shape[1]

    # Tile over rows: multiple of 8 (sublane), capped by tile_m; pad M if
    # needed so the grid divides evenly (padded rows are sliced off below).
    tm = min(tile_m, _round_up(M, 8))
    M_pad = _round_up(M, tm)
    if M_pad != M:
        x_flat = jnp.pad(x_flat, ((0, M_pad - M), (0, 0)))

    out = pl.pallas_call(
        _conv1x1_bias_kernel,
        grid=(M_pad // tm,),
        in_specs=[
            pl.BlockSpec((tm, Cin), lambda i: (i, 0)),     # activation tile
            pl.BlockSpec((Cin, Cout), lambda i: (0, 0)),   # weights (resident)
            pl.BlockSpec((1, Cout), lambda i: (0, 0)),     # bias (resident)
        ],
        out_specs=pl.BlockSpec((tm, Cout), lambda i: (i, 0)),
        out_shape=jax.ShapeDtypeStruct((M_pad, Cout), x_flat.dtype),
        compiler_params=pltpu.CompilerParams(
            # Independent row tiles -> megacore sharding on v7x.
            dimension_semantics=("parallel",),
        ),
    )(x_flat, w_mat, b_row)

    return out[:M] if M_pad != M else out


# ----------------------------------------------------------------------------
# PixelShuffle (pure layout permutation; plain-JAX glue)
# ----------------------------------------------------------------------------
def _pixel_shuffle_nhwc_to_nchw(y_nhwc, out_chans, r):
    # y_nhwc: [N, H, W, out_chans*r*r] with channel index k = c*r*r + i*r + j
    N, H, W, _ = y_nhwc.shape
    y6 = y_nhwc.reshape(N, H, W, out_chans, r, r)          # (n, h, w, c, i, j)
    y6 = jnp.transpose(y6, (0, 3, 1, 4, 2, 5))             # (n, c, h, i, w, j)
    return y6.reshape(N, out_chans, H * r, W * r)


# ----------------------------------------------------------------------------
# PatchUnEmbed forward
# ----------------------------------------------------------------------------
def patch_un_embed(x_nchw, params, *, patch_size, out_chans):
    """x: [N, embed_dim, H, W] -> [N, out_chans, H*patch_size, W*patch_size]."""
    # TODO(synk): kernel_size > 1 (reflect-padded KxK conv) path is not needed
    # for the module default (kernel_size=None -> 1); a general-K version
    # should accumulate K*K shifted matmuls per tile instead of im2col.
    N, Cin, H, W = x_nchw.shape
    x = jnp.transpose(x_nchw, (0, 2, 3, 1)).reshape(N * H * W, Cin)   # NHWC flat
    y = conv1x1(x, params["proj_w"], params["proj_b"])
    y = y.reshape(N, H, W, out_chans * patch_size * patch_size)
    return _pixel_shuffle_nhwc_to_nchw(y, out_chans, patch_size)


# ----------------------------------------------------------------------------
# Pure-JAX reference (high-precision) for a sanity check
# ----------------------------------------------------------------------------
def _reference(x_nchw, w_mat, b_row, patch_size, out_chans):
    N, Cin, H, W = x_nchw.shape
    y = jnp.einsum(
        "nchw,cd->ndhw", x_nchw, w_mat, precision=jax.lax.Precision.HIGHEST
    ) + b_row[0][None, :, None, None]
    r = patch_size
    y = y.reshape(N, out_chans, r, r, H, W)                # (n, c, i, j, h, w)
    y = jnp.transpose(y, (0, 1, 4, 2, 5, 3))               # (n, c, h, i, w, j)
    return y.reshape(N, out_chans, H * r, W * r)


if __name__ == "__main__":
    # Module defaults: patch_size=4, out_chans=3, embed_dim=96, kernel_size=1.
    patch_size, out_chans, embed_dim = 4, 3, 96
    N, H, W = 2, 8, 8

    key = jax.random.PRNGKey(0)
    kx, kw, kb = jax.random.split(key, 3)
    x = jax.random.normal(kx, (N, embed_dim, H, W), jnp.float32)

    cout_total = out_chans * patch_size ** 2
    params = {
        # nn.Conv2d weight [Cout, Cin, 1, 1] stored pre-transposed as [Cin, Cout]
        "proj_w": 0.05 * jax.random.normal(kw, (embed_dim, cout_total), jnp.float32),
        "proj_b": 0.05 * jax.random.normal(kb, (1, cout_total), jnp.float32),
    }

    fwd = jax.jit(
        functools.partial(patch_un_embed, patch_size=patch_size, out_chans=out_chans)
    )
    out = fwd(x, params)
    jax.block_until_ready(out)

    assert out.shape == (N, out_chans, H * patch_size, W * patch_size), out.shape
    assert bool(jnp.all(jnp.isfinite(out)))

    ref = _reference(x, params["proj_w"], params["proj_b"], patch_size, out_chans)
    max_err = float(jnp.max(jnp.abs(out - ref)))
    assert max_err < 3e-2, f"max |out - ref| = {max_err}"

    print("KERNEL_OK")
</pallas_src>

<mosaic_0001>
module attributes {stable_mosaic.version = 11 : i64} {
  func.func @_conv1x1_bias_kernel(%arg0: i32, %arg1: memref<128x96xf32, #tpu.memory_space<vmem>>, %arg2: memref<96x48xf32, #tpu.memory_space<vmem>>, %arg3: memref<1x48xf32, #tpu.memory_space<vmem>>, %arg4: memref<128x48xf32, #tpu.memory_space<vmem>>) attributes {dimension_semantics = [#tpu.dimension_semantics<parallel>], iteration_bounds = array<i64: 1>, scalar_prefetch = 0 : i64, scratch_operands = 0 : i64, tpu.core_type = #tpu.core_type<tc>, window_params = [{transform_indices = @transform_0, window_bounds = array<i64: 128, 96>}, {pipeline_mode = #tpu.pipeline_mode<synchronous>, transform_indices = @transform_1, window_bounds = array<i64: 96, 48>}, {pipeline_mode = #tpu.pipeline_mode<synchronous>, transform_indices = @transform_2, window_bounds = array<i64: 1, 48>}, {transform_indices = @transform_3, window_bounds = array<i64: 128, 48>}]} {
    %c0 = arith.constant 0 : index
    %c0_0 = arith.constant 0 : index
    %0 = vector.load %arg1[%c0, %c0_0] : memref<128x96xf32, #tpu.memory_space<vmem>>, vector<128x96xf32>
    %c0_1 = arith.constant 0 : index
    %c0_2 = arith.constant 0 : index
    %1 = vector.load %arg2[%c0_1, %c0_2] : memref<96x48xf32, #tpu.memory_space<vmem>>, vector<96x48xf32>
    %cst = arith.constant dense<0.000000e+00> : vector<128x48xf32>
    %2 = tpu.matmul %0, %1, %cst {dimension_numbers = #tpu.dot_dimension_numbers<[1], [0], [0], [1], [0, 0, 1, 1], [], []>} : vector<128x96xf32>, vector<96x48xf32>, vector<128x48xf32> -> vector<128x48xf32>
    %c0_3 = arith.constant 0 : index
    %c0_4 = arith.constant 0 : index
    %3 = vector.load %arg3[%c0_3, %c0_4] : memref<1x48xf32, #tpu.memory_space<vmem>>, vector<1x48xf32>
    %4 = vector.broadcast %3 : vector<1x48xf32> to vector<128x48xf32>
    %5 = arith.addf %2, %4 : vector<128x48xf32>
    %c0_5 = arith.constant 0 : index
    %c0_6 = arith.constant 0 : index
    %6 = vector.load %arg4[%c0_5, %c0_6] : memref<128x48xf32, #tpu.memory_space<vmem>>, vector<128x48xf32>
    tpu.vector_store %arg4[%c0_5, %c0_6], %5 {strides = array<i32>} : memref<128x48xf32, #tpu.memory_space<vmem>>, vector<128x48xf32>,
    return
  }
  func.func @transform_0(%arg0: i32) -> (i32, i32) {
    %c0_i32 = arith.constant 0 : i32
    %c0_i32_0 = arith.constant 0 : i32
    return %arg0, %c0_i32 : i32, i32
  }
  func.func @transform_1(%arg0: i32) -> (i32, i32) {
    %c0_i32 = arith.constant 0 : i32
    %c0_i32_0 = arith.constant 0 : i32
    %c0_i32_1 = arith.constant 0 : i32
    return %c0_i32, %c0_i32_0 : i32, i32
  }
  func.func @transform_2(%arg0: i32) -> (i32, i32) {
    %c0_i32 = arith.constant 0 : i32
    %c0_i32_0 = arith.constant 0 : i32
    %c0_i32_1 = arith.constant 0 : i32
    return %c0_i32, %c0_i32_0 : i32, i32
  }
  func.func @transform_3(%arg0: i32) -> (i32, i32) {
    %c0_i32 = arith.constant 0 : i32
    %c0_i32_0 = arith.constant 0 : i32
    return %arg0, %c0_i32 : i32, i32
  }
}

</mosaic_0001>

<bundles_post_ra>
// kernel: patch_un_embed.1
= control target key start
LH: loop header
LB: loop body
LE: loop exit
PB: predicated region body
PF: predicated region fallthrough
CT: control target
= control target key end

     0   :  { %vm46_vm0 = vcmask 785408   ;;  %vm160_vm1 = vcmask 392192   ;;  %s421_s1 = inlined_call_operand.vmem [shape: f32[96,48], index: 1, kind: input, shape index: {}]   ;;  %s422_s2 = inlined_call_operand.vmem [shape: f32[1,48], index: 2, kind: input, shape index: {}]   ;;  %s423_s0 = inlined_call_operand.vmem [shape: f32[128,96], index: 0, kind: input, shape index: {}]   ;;  %s424_s3 = inlined_call_operand.vmem [shape: f32[128,48], index: 3, kind: output, shape index: {}]  }
   0x1   :  { %v41_v0 = vld [vmem:[%s421_s1 + $0x58] sm:$0xff]  ;;  %v40_v1 = vld [vmem:[%s421_s1 + $0x50] sm:$0xff]  ;;  %v39_v2 = vld [vmem:[%s421_s1 + $0x48] sm:$0xff] }
   0x2   :  { %198 = vmatpush.msra.mxu2 %v41_v0  ;;  %199 = vmatpush.msra.mxu3 %v41_v0  ;;  %v38_v3 = vld [vmem:[%s421_s1 + $0x40] sm:$0xff]  ;;  %v37_v4 = vld [vmem:[%s421_s1 + $0x38] sm:$0xff]  ;;  %v36_v5 = vld [vmem:[%s421_s1 + $0x30] sm:$0xff] }
   0x3   :  { %99 = vmatpush.msra.mxu0 %v41_v0  ;;  %197 = vmatpush.msra.mxu1 %v41_v0  ;;  %v35_v6 = vld [vmem:[%s421_s1 + $0x28] sm:$0xff]  ;;  %v34_v7 = vld [vmem:[%s421_s1 + $0x20] sm:$0xff]  ;;  %v33_v8 = vld [vmem:[%s421_s1 + $0x18] sm:$0xff] }
   0x4   :  { %201 = vmatpush.msra.mxu2 %v40_v1  ;;  %202 = vmatpush.msra.mxu3 %v40_v1  ;;  %v32_v9 = vld [vmem:[%s421_s1 + $0x10] sm:$0xff]  ;;  %v31_v10 = vld [vmem:[%s421_s1 + $0x8] sm:$0xff]  ;;  %v30_v11 = vld [vmem:[%s421_s1] sm:$0xff] }
   0x5   :  { %100 = vmatpush.msra.mxu0 %v40_v1  ;;  %200 = vmatpush.msra.mxu1 %v40_v1  ;;  %v22_v12 = vld [vmem:[%s423_s0 + $0x40] sm:$0xff]  ;;  %v23_v16 = vld [vmem:[%s423_s0 + $0x48] sm:$0xff]  ;;  %v24_v20 = vld [vmem:[%s423_s0 + $0x50] sm:$0xff] }
   0x6   :  { %204 = vmatpush.msra.mxu2 %v39_v2  ;;  %205 = vmatpush.msra.mxu3 %v39_v2  ;;  %v26_v13 = vld [vmem:[%s423_s0 + $0x60] sm:$0xff]  ;;  %v27_v17 = vld [vmem:[%s423_s0 + $0x68] sm:$0xff]  ;;  %v28_v21 = vld [vmem:[%s423_s0 + $0x70] sm:$0xff] }
   0x7   :  { %101 = vmatpush.msra.mxu0 %v39_v2  ;;  %203 = vmatpush.msra.mxu1 %v39_v2  ;;  %v14_v14 = vld [vmem:[%s423_s0] sm:$0xff]  ;;  %v15_v18 = vld [vmem:[%s423_s0 + $0x8] sm:$0xff]  ;;  %v16_v22 = vld [vmem:[%s423_s0 + $0x10] sm:$0xff] }
   0x8   :  { %207 = vmatpush.msra.mxu2 %v38_v3  ;;  %208 = vmatpush.msra.mxu3 %v38_v3  ;;  %v18_v15 = vld [vmem:[%s423_s0 + $0x20] sm:$0xff]  ;;  %v19_v19 = vld [vmem:[%s423_s0 + $0x28] sm:$0xff]  ;;  %v20_v23 = vld [vmem:[%s423_s0 + $0x30] sm:$0xff] }
   0x9   :  { %102 = vmatpush.msra.mxu0 %v38_v3  ;;  %206 = vmatpush.msra.mxu1 %v38_v3  ;;  %v25_v24 = vld [vmem:[%s423_s0 + $0x58] sm:$0xff]  ;;  %v233_v28 = vld [vmem:[%s422_s2] ss:$0 sm:$0xff] }
   0xa   :  { %210 = vmatpush.msra.mxu2 %v37_v4  ;;  %211 = vmatpush.msra.mxu3 %v37_v4  ;;  %v29_v25 = vld [vmem:[%s423_s0 + $0x78] sm:$0xff] }
   0xb   :  { %103 = vmatpush.msra.mxu0 %v37_v4  ;;  %209 = vmatpush.msra.mxu1 %v37_v4  ;;  %v17_v26 = vld [vmem:[%s423_s0 + $0x18] sm:$0xff] }
   0xc   :  { %213 = vmatpush.msra.mxu2 %v36_v5  ;;  %214 = vmatpush.msra.mxu3 %v36_v5  ;;  %v21_v27 = vld [vmem:[%s423_s0 + $0x38] sm:$0xff] }
   0xd   :  { %104 = vmatpush.msra.mxu0 %v36_v5  ;;  %212 = vmatpush.msra.mxu1 %v36_v5 }
   0xe   :  { %216 = vmatpush.msra.mxu2 %v35_v6  ;;  %217 = vmatpush.msra.mxu3 %v35_v6 }
   0xf   :  { %105 = vmatpush.msra.mxu0 %v35_v6  ;;  %215 = vmatpush.msra.mxu1 %v35_v6 }
  0x10   :  { %219 = vmatpush.msra.mxu2 %v34_v7  ;;  %220 = vmatpush.msra.mxu3 %v34_v7 }
  0x11   :  { %106 = vmatpush.msra.mxu0 %v34_v7  ;;  %218 = vmatpush.msra.mxu1 %v34_v7 }
  0x12   :  { %222 = vmatpush.msra.mxu2 %v33_v8  ;;  %223 = vmatpush.msra.mxu3 %v33_v8 }
  0x13   :  { %107 = vmatpush.msra.mxu0 %v33_v8  ;;  %221 = vmatpush.msra.mxu1 %v33_v8 }
  0x14   :  { %225 = vmatpush.msra.mxu2 %v32_v9  ;;  %226 = vmatpush.msra.mxu3 %v32_v9 }
  0x15   :  { %108 = vmatpush.msra.mxu0 %v32_v9  ;;  %224 = vmatpush.msra.mxu1 %v32_v9 }
  0x16   :  { %228 = vmatpush.msra.mxu2 %v31_v10  ;;  %229 = vmatpush.msra.mxu3 %v31_v10 }
  0x17   :  { %109 = vmatpush.msra.mxu0 %v31_v10  ;;  %227 = vmatpush.msra.mxu1 %v31_v10 }
  0x18   :  { %231 = vmatpush.msra.mxu2 %v30_v11  ;;  %232 = vmatpush.msra.mxu3 %v30_v11 }
  0x19   :  { %189 = vmatmul.msk.f32.vlgmr.msra.gmra.mxu2 %vm46_vm0, %v22_v12  ;;  %193 = vmatmul.msk.f32.vlgmr.msra.gmra.mxu3 %vm46_vm0, %v26_v13 }
  0x1a   :  { %110 = vmatpush.msra.mxu0 %v30_v11  ;;  %230 = vmatpush.msra.mxu1 %v30_v11 }
  0x1b   :  { %181 = vmatmul.msk.f32.vlgmr.msra.gmra.mxu0 %vm46_vm0, %v14_v14  ;;  %185 = vmatmul.msk.f32.vlgmr.msra.gmra.mxu1 %vm46_vm0, %v18_v15 }
  0x21   :  { %190 = vmatmul.msk.f32.gmra.mxu2 %vm46_vm0, %v23_v16  ;;  %194 = vmatmul.msk.f32.gmra.mxu3 %vm46_vm0, %v27_v17 }
  0x23   :  { %182 = vmatmul.msk.f32.gmra.mxu0 %vm46_vm0, %v15_v18  ;;  %186 = vmatmul.msk.f32.gmra.mxu1 %vm46_vm0, %v19_v19 }
  0x29   :  { %191 = vmatmul.msk.f32.gmra.mxu2 %vm46_vm0, %v24_v20  ;;  %195 = vmatmul.msk.f32.gmra.mxu3 %vm46_vm0, %v28_v21 }
  0x2b   :  { %183 = vmatmul.msk.f32.gmra.mxu0 %vm46_vm0, %v16_v22  ;;  %187 = vmatmul.msk.f32.gmra.mxu1 %vm46_vm0, %v20_v23 }
  0x31   :  { %192 = vmatmul.msk.f32.gmra.mxu2 %vm46_vm0, %v25_v24  ;;  %196 = vmatmul.msk.f32.gmra.mxu3 %vm46_vm0, %v29_v25 }
  0x33   :  { %184 = vmatmul.msk.f32.gmra.mxu0 %vm46_vm0, %v17_v26  ;;  %188 = vmatmul.msk.f32.gmra.mxu1 %vm46_vm0, %v21_v27 }
  0x98   :  { %v112_v29 = vpop.f32.mrf.mxu0  ;;  %v124_v30 = vpop.f32.mrf.mxu1 }
  0x99   :  { %v113_v31 = vadd.f32 %v233_v28, %v112_v29  ;;  %v125_v32 = vadd.f32 %v233_v28, %v124_v30 }
  0x9b   :  { %161 = vst.msk [vmem:[%s424_s3] sm:$0xff] %vm160_vm1, %v113_v31 }
  0x9c   :  { %165 = vst.msk [vmem:[%s424_s3 + $0x20] sm:$0xff] %vm160_vm1, %v125_v32  ;;  %v136_v33 = vpop.f32.mrf.mxu2  ;;  %v148_v34 = vpop.f32.mrf.mxu3 }
  0x9d   :  { %v137_v35 = vadd.f32 %v233_v28, %v136_v33  ;;  %v149_v36 = vadd.f32 %v233_v28, %v148_v34 }
  0x9f   :  { %169 = vst.msk [vmem:[%s424_s3 + $0x40] sm:$0xff] %vm160_vm1, %v137_v35 }
  0xa0   :  { %173 = vst.msk [vmem:[%s424_s3 + $0x60] sm:$0xff] %vm160_vm1, %v149_v36  ;;  %v115_v37 = vpop.f32.mrf.mxu0  ;;  %v127_v38 = vpop.f32.mrf.mxu1 }
  0xa1   :  { %v116_v39 = vadd.f32 %v233_v28, %v115_v37  ;;  %v128_v40 = vadd.f32 %v233_v28, %v127_v38 }
  0xa3   :  { %162 = vst.msk [vmem:[%s424_s3 + $0x8] sm:$0xff] %vm160_vm1, %v116_v39 }
  0xa4   :  { %166 = vst.msk [vmem:[%s424_s3 + $0x28] sm:$0xff] %vm160_vm1, %v128_v40  ;;  %v139_v41 = vpop.f32.mrf.mxu2  ;;  %v151_v42 = vpop.f32.mrf.mxu3 }
  0xa5   :  { %v140_v43 = vadd.f32 %v233_v28, %v139_v41  ;;  %v152_v44 = vadd.f32 %v233_v28, %v151_v42 }
  0xa7   :  { %170 = vst.msk [vmem:[%s424_s3 + $0x48] sm:$0xff] %vm160_vm1, %v140_v43 }
  0xa8   :  { %174 = vst.msk [vmem:[%s424_s3 + $0x68] sm:$0xff] %vm160_vm1, %v152_v44  ;;  %v118_v45 = vpop.f32.mrf.mxu0  ;;  %v130_v46 = vpop.f32.mrf.mxu1 }
  0xa9   :  { %v119_v47 = vadd.f32 %v233_v28, %v118_v45  ;;  %v131_v48 = vadd.f32 %v233_v28, %v130_v46 }
  0xab   :  { %163 = vst.msk [vmem:[%s424_s3 + $0x10] sm:$0xff] %vm160_vm1, %v119_v47 }
  0xac   :  { %167 = vst.msk [vmem:[%s424_s3 + $0x30] sm:$0xff] %vm160_vm1, %v131_v48  ;;  %v142_v49 = vpop.f32.mrf.mxu2  ;;  %v154_v50 = vpop.f32.mrf.mxu3 }
  0xad   :  { %v143_v51 = vadd.f32 %v233_v28, %v142_v49  ;;  %v155_v52 = vadd.f32 %v233_v28, %v154_v50 }
  0xaf   :  { %171 = vst.msk [vmem:[%s424_s3 + $0x50] sm:$0xff] %vm160_vm1, %v143_v51 }
  0xb0   :  { %175 = vst.msk [vmem:[%s424_s3 + $0x70] sm:$0xff] %vm160_vm1, %v155_v52  ;;  %v121_v53 = vpop.f32.mrf.mxu0  ;;  %v133_v54 = vpop.f32.mrf.mxu1 }
  0xb1   :  { %v122_v55 = vadd.f32 %v233_v28, %v121_v53  ;;  %v134_v56 = vadd.f32 %v233_v28, %v133_v54 }
  0xb3   :  { %164 = vst.msk [vmem:[%s424_s3 + $0x18] sm:$0xff] %vm160_vm1, %v122_v55 }
  0xb4   :  { %168 = vst.msk [vmem:[%s424_s3 + $0x38] sm:$0xff] %vm160_vm1, %v134_v56  ;;  %v145_v57 = vpop.f32.mrf.mxu2  ;;  %v157_v58 = vpop.f32.mrf.mxu3 }
  0xb5   :  { %v146_v59 = vadd.f32 %v233_v28, %v145_v57  ;;  %v158_v60 = vadd.f32 %v233_v28, %v157_v58 }
  0xb7   :  { %172 = vst.msk [vmem:[%s424_s3 + $0x58] sm:$0xff] %vm160_vm1, %v146_v59 }
  0xb8   :  { %176 = vst.msk [vmem:[%s424_s3 + $0x78] sm:$0xff] %vm160_vm1, %v158_v60 }

</bundles_post_ra>
